<compile_context>
chip_gen: v7x
topology: tpu7x:2x2x1
jax: 0.10.0
libtpu: 0.0.40
codegen_flags: <defaults>
</compile_context>

<pallas_src>
import functools

import jax
import jax.numpy as jnp
from jax.experimental import pallas as pl
from jax.experimental.pallas import tpu as pltpu


HIDDEN = 128          # hidden_dim of the PyTorch module
N_CLASSES = 3         # actor head width
PAD = 128             # lane-padded actor head width
ALIGN = 16            # row-tile alignment (covers bf16 sublane packing too)


def _round_up(n, m):
    return ((n + m - 1) // m) * m


def _choose_tile(batch, block_rows):
    """Pick a row tile (multiple of ALIGN) and padded batch.

    Keeps the grid at >= 2 steps whenever the batch allows it so that
    dimension_semantics=("parallel",) can shard across both TensorCores (v7x).
    """
    block_rows = _round_up(max(block_rows, ALIGN), ALIGN)
    b_al = _round_up(max(batch, 1), ALIGN)
    steps = max(2, -(-b_al // block_rows))                 # ceil-div, >= 2
    tile = min(block_rows, _round_up(-(-b_al // steps), ALIGN))
    b_pad = _round_up(b_al, tile)
    return tile, b_pad


def dqn_kernel(x_ref, w1_ref, b1_ref, w2_ref, b2_ref, w3_ref, b3_ref, o_ref,
               *, approx: bool):
    """One row-tile, both branches, packed 128-lane output.

    x_ref : (T, 4)      last four input columns [-4, -3, -2, -1]   (f32)
    w1    : (2, 128) f32, b1: (1, 128) f32
    w2    : (128,128) f32/bf16,        b2: (1, 128) f32
    w3    : (128,128) lane-padded head (f32/bf16), b3: (1,128) f32 (-1e30 pads)
    o_ref : (T, 128)    lanes 0..2 = branch_x probs, lanes 64..66 = branch_y.
    """
    x4 = x_ref[...]                                  # (T, 4) f32
    w1 = w1_ref[...]                                 # (2, 128)
    b1 = b1_ref[...]                                 # (1, 128)
    w2 = w2_ref[...]                                 # (128, 128) MXU dtype
    b2 = b2_ref[...]                                 # (1, 128) f32
    w3 = w3_ref[...]                                 # (128, 128) MXU dtype
    b3 = b3_ref[...]                                 # (1, 128) f32
    mxu_dtype = w2.dtype

    w1_r0 = w1[0:1, :]
    w1_r1 = w1[1:2, :]

    def branch(c0, c1):
        # Layer 1 on the VPU: K=2 would waste a full MXU push/pop.
        h1 = jnp.maximum(c0 * w1_r0 + c1 * w1_r1 + b1, 0.0)          # (T, 128)
        # Layers 2 & 3 on the MXU, f32 accumulation.
        h2 = jnp.dot(h1.astype(mxu_dtype), w2,
                     preferred_element_type=jnp.float32) + b2
        h2 = jnp.maximum(h2, 0.0)
        logits = jnp.dot(h2.astype(mxu_dtype), w3,
                         preferred_element_type=jnp.float32) + b3
        # Padded lanes carry bias -1e30 -> exp underflows to exactly 0.
        m = jnp.max(logits, axis=-1, keepdims=True)
        e = jnp.exp(logits - m)
        denom = jnp.sum(e, axis=-1, keepdims=True)
        return e * pl.reciprocal(denom, approx=approx)               # (T, 128)

    probs_x = branch(x4[:, 0:1], x4[:, 2:3])   # input columns [-4, -2]
    probs_y = branch(x4[:, 1:2], x4[:, 3:4])   # input columns [-3, -1]

    # Pack both branches into one 128-lane slab: padded lanes are exactly 0, so
    # an XLU roll + add interleaves them with no masked stores.
    packed = probs_x + pltpu.roll(probs_y, shift=PAD // 2, axis=1)
    o_ref[...] = packed.astype(o_ref.dtype)


def init_params(key, input_dim=2, hidden_dim=HIDDEN, out_dim=N_CLASSES,
                dtype=jnp.float32):
    """Deterministic init mimicking torch.nn.Linear (U(-1/sqrt(fan_in), +))."""
    ks = jax.random.split(key, 6)

    def lin(kw, kb, fan_in, fan_out):
        bound = 1.0 / jnp.sqrt(jnp.asarray(fan_in, dtype))
        w = jax.random.uniform(kw, (fan_in, fan_out), dtype, -bound, bound)
        b = jax.random.uniform(kb, (1, fan_out), dtype, -bound, bound)
        return w, b

    w1, b1 = lin(ks[0], ks[1], input_dim, hidden_dim)
    w2, b2 = lin(ks[2], ks[3], hidden_dim, hidden_dim)
    w3, b3 = lin(ks[4], ks[5], hidden_dim, out_dim)
    return (w1, b1, w2, b2, w3, b3)


def dqn_forward(x, params, *, block_rows=1024, mxu_dtype=jnp.bfloat16,
                out_dtype=jnp.bfloat16, approx_softmax=True, interpret=False):
    """x: (B, F) with F >= 4.  Returns (B, 2, 3) == torch.stack([p_x, p_y], -2)."""
    B, F = x.shape
    assert F >= 4, "module indexes the last 4 input columns"
    w1, b1, w2, b2, w3, b3 = params
    H = w1.shape[1]
    OUT = w3.shape[1]

    # Lane-pad the actor head: zero weights, -1e30 bias in the padded classes.
    w3p = jnp.zeros((H, PAD), jnp.float32).at[:, :OUT].set(w3.astype(jnp.float32))
    b3p = jnp.full((1, PAD), -1e30, jnp.float32).at[:, :OUT].set(
        b3.reshape(1, OUT).astype(jnp.float32))

    w1f = w1.astype(jnp.float32)
    b1f = b1.reshape(1, H).astype(jnp.float32)
    b2f = b2.reshape(1, H).astype(jnp.float32)
    w2c = w2.astype(mxu_dtype)            # MXU operands only; math stays f32
    w3c = w3p.astype(mxu_dtype)

    # Only the 4 columns the module reads; branch selection happens in-kernel.
    x4 = x[:, F - 4:].astype(jnp.float32)                 # (B, 4)

    # Row tiling: big tiles to amortize per-step overhead, >=2 steps for v7x.
    T, B_pad = _choose_tile(B, block_rows)
    if B_pad != B:
        x4 = jnp.pad(x4, ((0, B_pad - B), (0, 0)))
    grid = (B_pad // T,)

    weight_bytes = sum(int(a.size) * a.dtype.itemsize
                       for a in (w1f, b1f, w2c, b2f, w3c, b3p))
    cost = pl.CostEstimate(
        flops=4 * B_pad * H * H * 2,                       # 2 branches x 2 matmuls
        transcendentals=2 * B_pad * PAD,                   # exp (per branch)
        bytes_accessed=(B_pad * 4 * 4 + weight_bytes
                        + B_pad * PAD * jnp.dtype(out_dtype).itemsize))

    kernel = functools.partial(dqn_kernel, approx=approx_softmax)

    out = pl.pallas_call(
        kernel,
        out_shape=jax.ShapeDtypeStruct((B_pad, PAD), out_dtype),
        grid_spec=pltpu.PrefetchScalarGridSpec(
            num_scalar_prefetch=0,
            grid=grid,
            in_specs=[
                pl.BlockSpec((T, 4), lambda i: (i, 0)),       # x tile
                pl.BlockSpec((2, H), lambda i: (0, 0)),       # w1 (resident)
                pl.BlockSpec((1, H), lambda i: (0, 0)),       # b1
                pl.BlockSpec((H, H), lambda i: (0, 0)),       # w2
                pl.BlockSpec((1, H), lambda i: (0, 0)),       # b2
                pl.BlockSpec((H, PAD), lambda i: (0, 0)),     # w3 (padded)
                pl.BlockSpec((1, PAD), lambda i: (0, 0)),     # b3 (padded)
            ],
            out_specs=pl.BlockSpec((T, PAD), lambda i: (i, 0)),
        ),
        compiler_params=pltpu.CompilerParams(
            dimension_semantics=("parallel",),
            vmem_limit_bytes=32 * 1024 * 1024),
        cost_estimate=cost,
        interpret=interpret,
    )(x4, w1f, b1f, w2c, b2f, w3c, b3p)

    # Unpack: lanes 0..2 -> branch_x probs, lanes 64..66 -> branch_y probs.
    out = out[:B].astype(jnp.float32)                      # (B, 128)
    prob_x = out[:, :OUT]
    prob_y = out[:, PAD // 2:PAD // 2 + OUT]
    return jnp.stack([prob_x, prob_y], axis=-2)            # (B, 2, 3)


def dqn_forward_ref(x, params):
    """Pure-JAX reference of the PyTorch forward (for verification)."""
    w1, b1, w2, b2, w3, b3 = params

    def branch(inp):
        h = jnp.maximum(inp @ w1 + b1, 0.0)
        h = jnp.maximum(h @ w2 + b2, 0.0)
        logits = h @ w3 + b3
        return jax.nn.softmax(logits, axis=-1)

    prob_x = branch(x[:, jnp.array([-4, -2]) % x.shape[1]])
    prob_y = branch(x[:, jnp.array([-3, -1]) % x.shape[1]])
    return jnp.stack([prob_x, prob_y], axis=-2)


if __name__ == "__main__":
    key = jax.random.PRNGKey(0)
    k_params, k_x, k_x2 = jax.random.split(key, 3)

    params = init_params(k_params)

    # Small, deterministic inputs; odd batch exercises the ragged-tail padding.
    B, F = 37, 6
    x = jax.random.normal(k_x, (B, F), dtype=jnp.float32)
    ref = dqn_forward_ref(x, params)

    # 1) Exact path (f32 MXU operands, exact reciprocal, f32 output): tight tol.
    out = jax.block_until_ready(
        dqn_forward(x, params, mxu_dtype=jnp.float32, out_dtype=jnp.float32,
                    approx_softmax=False))
    assert out.shape == (B, 2, 3), out.shape
    assert jnp.allclose(out, ref, atol=1e-5, rtol=1e-5), "mismatch vs reference (f32)"
    assert jnp.allclose(jnp.sum(out, axis=-1), 1.0, atol=1e-5), "rows must sum to 1"

    # 2) Optimized path (bf16 MXU operands + approx EUP reciprocal + bf16
    #    packed output), multi-tile grid: looser tolerance.
    B2 = 300
    x2 = jax.random.normal(k_x2, (B2, F), dtype=jnp.float32)
    ref2 = dqn_forward_ref(x2, params)
    out2 = jax.block_until_ready(
        dqn_forward(x2, params, block_rows=1024,
                    mxu_dtype=jnp.bfloat16, out_dtype=jnp.bfloat16,
                    approx_softmax=True))
    assert out2.shape == (B2, 2, 3), out2.shape
    assert jnp.allclose(out2, ref2, atol=3e-2, rtol=0.0), "mismatch vs reference (bf16)"
    assert jnp.allclose(jnp.sum(out2, axis=-1), 1.0, atol=2e-2), "rows must sum to ~1"

    print("KERNEL_OK")
</pallas_src>

<mosaic_0001>
module attributes {stable_mosaic.version = 11 : i64} {
  func.func @dqn_kernel(%arg0: i32, %arg1: memref<32x4xf32, #tpu.memory_space<vmem>>, %arg2: memref<2x128xf32, #tpu.memory_space<vmem>>, %arg3: memref<1x128xf32, #tpu.memory_space<vmem>>, %arg4: memref<128x128xf32, #tpu.memory_space<vmem>>, %arg5: memref<1x128xf32, #tpu.memory_space<vmem>>, %arg6: memref<128x128xf32, #tpu.memory_space<vmem>>, %arg7: memref<1x128xf32, #tpu.memory_space<vmem>>, %arg8: memref<32x128xf32, #tpu.memory_space<vmem>>) attributes {dimension_semantics = [#tpu.dimension_semantics<parallel>], iteration_bounds = array<i64: 2>, scalar_prefetch = 0 : i64, scratch_operands = 0 : i64, tpu.core_type = #tpu.core_type<tc>, window_params = [{transform_indices = @transform_0, window_bounds = array<i64: 32, 4>}, {pipeline_mode = #tpu.pipeline_mode<synchronous>, transform_indices = @transform_1, window_bounds = array<i64: 2, 128>}, {pipeline_mode = #tpu.pipeline_mode<synchronous>, transform_indices = @transform_2, window_bounds = array<i64: 1, 128>}, {pipeline_mode = #tpu.pipeline_mode<synchronous>, transform_indices = @transform_3, window_bounds = array<i64: 128, 128>}, {pipeline_mode = #tpu.pipeline_mode<synchronous>, transform_indices = @transform_4, window_bounds = array<i64: 1, 128>}, {pipeline_mode = #tpu.pipeline_mode<synchronous>, transform_indices = @transform_5, window_bounds = array<i64: 128, 128>}, {pipeline_mode = #tpu.pipeline_mode<synchronous>, transform_indices = @transform_6, window_bounds = array<i64: 1, 128>}, {transform_indices = @transform_7, window_bounds = array<i64: 32, 128>}]} {
    %c0 = arith.constant 0 : index
    %c0_0 = arith.constant 0 : index
    %0 = vector.load %arg1[%c0, %c0_0] : memref<32x4xf32, #tpu.memory_space<vmem>>, vector<32x4xf32>
    %c0_1 = arith.constant 0 : index
    %c0_2 = arith.constant 0 : index
    %1 = vector.load %arg2[%c0_1, %c0_2] : memref<2x128xf32, #tpu.memory_space<vmem>>, vector<2x128xf32>
    %c0_3 = arith.constant 0 : index
    %c0_4 = arith.constant 0 : index
    %2 = vector.load %arg3[%c0_3, %c0_4] : memref<1x128xf32, #tpu.memory_space<vmem>>, vector<1x128xf32>
    %c0_5 = arith.constant 0 : index
    %c0_6 = arith.constant 0 : index
    %3 = vector.load %arg4[%c0_5, %c0_6] : memref<128x128xf32, #tpu.memory_space<vmem>>, vector<128x128xf32>
    %c0_7 = arith.constant 0 : index
    %c0_8 = arith.constant 0 : index
    %4 = vector.load %arg5[%c0_7, %c0_8] : memref<1x128xf32, #tpu.memory_space<vmem>>, vector<1x128xf32>
    %c0_9 = arith.constant 0 : index
    %c0_10 = arith.constant 0 : index
    %5 = vector.load %arg6[%c0_9, %c0_10] : memref<128x128xf32, #tpu.memory_space<vmem>>, vector<128x128xf32>
    %c0_11 = arith.constant 0 : index
    %c0_12 = arith.constant 0 : index
    %6 = vector.load %arg7[%c0_11, %c0_12] : memref<1x128xf32, #tpu.memory_space<vmem>>, vector<1x128xf32>
    %7 = vector.extract_strided_slice %1 {offsets = [0, 0], sizes = [1, 128], strides = [1, 1]} : vector<2x128xf32> to vector<1x128xf32>
    %8 = vector.extract_strided_slice %1 {offsets = [1, 0], sizes = [1, 128], strides = [1, 1]} : vector<2x128xf32> to vector<1x128xf32>
    %9 = vector.extract_strided_slice %0 {offsets = [0, 0], sizes = [32, 1], strides = [1, 1]} : vector<32x4xf32> to vector<32x1xf32>
    %10 = vector.extract_strided_slice %0 {offsets = [0, 2], sizes = [32, 1], strides = [1, 1]} : vector<32x4xf32> to vector<32x1xf32>
    %11 = vector.broadcast %9 : vector<32x1xf32> to vector<32x128xf32>
    %12 = vector.broadcast %7 : vector<1x128xf32> to vector<32x128xf32>
    %13 = arith.mulf %11, %12 : vector<32x128xf32>
    %14 = vector.broadcast %10 : vector<32x1xf32> to vector<32x128xf32>
    %15 = vector.broadcast %8 : vector<1x128xf32> to vector<32x128xf32>
    %16 = arith.mulf %14, %15 : vector<32x128xf32>
    %17 = arith.addf %13, %16 : vector<32x128xf32>
    %18 = vector.broadcast %2 : vector<1x128xf32> to vector<32x128xf32>
    %19 = arith.addf %17, %18 : vector<32x128xf32>
    %cst = arith.constant 0.000000e+00 : f32
    %20 = vector.broadcast %cst : f32 to vector<32x128xf32>
    %21 = arith.maximumf %19, %20 : vector<32x128xf32>
    %cst_13 = arith.constant dense<0.000000e+00> : vector<32x128xf32>
    %22 = tpu.matmul %21, %3, %cst_13 {dimension_numbers = #tpu.dot_dimension_numbers<[1], [0], [0], [1], [0, 0, 1, 1], [], []>} : vector<32x128xf32>, vector<128x128xf32>, vector<32x128xf32> -> vector<32x128xf32>
    %23 = vector.broadcast %4 : vector<1x128xf32> to vector<32x128xf32>
    %24 = arith.addf %22, %23 : vector<32x128xf32>
    %cst_14 = arith.constant 0.000000e+00 : f32
    %25 = vector.broadcast %cst_14 : f32 to vector<32x128xf32>
    %26 = arith.maximumf %24, %25 : vector<32x128xf32>
    %cst_15 = arith.constant dense<0.000000e+00> : vector<32x128xf32>
    %27 = tpu.matmul %26, %5, %cst_15 {dimension_numbers = #tpu.dot_dimension_numbers<[1], [0], [0], [1], [0, 0, 1, 1], [], []>} : vector<32x128xf32>, vector<128x128xf32>, vector<32x128xf32> -> vector<32x128xf32>
    %28 = vector.broadcast %6 : vector<1x128xf32> to vector<32x128xf32>
    %29 = arith.addf %27, %28 : vector<32x128xf32>
    %cst_16 = arith.constant dense<0xFF800000> : vector<32xf32>
    %30 = vector.multi_reduction <maximumf>, %29, %cst_16 [1] : vector<32x128xf32> to vector<32xf32>
    %31 = vector.shape_cast %30 : vector<32xf32> to vector<32x1xf32>
    %32 = vector.broadcast %31 : vector<32x1xf32> to vector<32x128xf32>
    %33 = arith.subf %29, %32 : vector<32x128xf32>
    %34 = math.exp %33 : vector<32x128xf32>
    %cst_17 = arith.constant dense<0.000000e+00> : vector<32xf32>
    %35 = vector.multi_reduction <add>, %34, %cst_17 [1] : vector<32x128xf32> to vector<32xf32>
    %36 = vector.shape_cast %35 : vector<32xf32> to vector<32x1xf32>
    %37 = tpu.reciprocal %36 : vector<32x1xf32> -> vector<32x1xf32>
    %38 = vector.broadcast %37 : vector<32x1xf32> to vector<32x128xf32>
    %39 = arith.mulf %34, %38 : vector<32x128xf32>
    %40 = vector.extract_strided_slice %0 {offsets = [0, 1], sizes = [32, 1], strides = [1, 1]} : vector<32x4xf32> to vector<32x1xf32>
    %41 = vector.extract_strided_slice %0 {offsets = [0, 3], sizes = [32, 1], strides = [1, 1]} : vector<32x4xf32> to vector<32x1xf32>
    %42 = vector.broadcast %40 : vector<32x1xf32> to vector<32x128xf32>
    %43 = vector.broadcast %7 : vector<1x128xf32> to vector<32x128xf32>
    %44 = arith.mulf %42, %43 : vector<32x128xf32>
    %45 = vector.broadcast %41 : vector<32x1xf32> to vector<32x128xf32>
    %46 = vector.broadcast %8 : vector<1x128xf32> to vector<32x128xf32>
    %47 = arith.mulf %45, %46 : vector<32x128xf32>
    %48 = arith.addf %44, %47 : vector<32x128xf32>
    %49 = vector.broadcast %2 : vector<1x128xf32> to vector<32x128xf32>
    %50 = arith.addf %48, %49 : vector<32x128xf32>
    %cst_18 = arith.constant 0.000000e+00 : f32
    %51 = vector.broadcast %cst_18 : f32 to vector<32x128xf32>
    %52 = arith.maximumf %50, %51 : vector<32x128xf32>
    %cst_19 = arith.constant dense<0.000000e+00> : vector<32x128xf32>
    %53 = tpu.matmul %52, %3, %cst_19 {dimension_numbers = #tpu.dot_dimension_numbers<[1], [0], [0], [1], [0, 0, 1, 1], [], []>} : vector<32x128xf32>, vector<128x128xf32>, vector<32x128xf32> -> vector<32x128xf32>
    %54 = vector.broadcast %4 : vector<1x128xf32> to vector<32x128xf32>
    %55 = arith.addf %53, %54 : vector<32x128xf32>
    %cst_20 = arith.constant 0.000000e+00 : f32
    %56 = vector.broadcast %cst_20 : f32 to vector<32x128xf32>
    %57 = arith.maximumf %55, %56 : vector<32x128xf32>
    %cst_21 = arith.constant dense<0.000000e+00> : vector<32x128xf32>
    %58 = tpu.matmul %57, %5, %cst_21 {dimension_numbers = #tpu.dot_dimension_numbers<[1], [0], [0], [1], [0, 0, 1, 1], [], []>} : vector<32x128xf32>, vector<128x128xf32>, vector<32x128xf32> -> vector<32x128xf32>
    %59 = vector.broadcast %6 : vector<1x128xf32> to vector<32x128xf32>
    %60 = arith.addf %58, %59 : vector<32x128xf32>
    %cst_22 = arith.constant dense<0xFF800000> : vector<32xf32>
    %61 = vector.multi_reduction <maximumf>, %60, %cst_22 [1] : vector<32x128xf32> to vector<32xf32>
    %62 = vector.shape_cast %61 : vector<32xf32> to vector<32x1xf32>
    %63 = vector.broadcast %62 : vector<32x1xf32> to vector<32x128xf32>
    %64 = arith.subf %60, %63 : vector<32x128xf32>
    %65 = math.exp %64 : vector<32x128xf32>
    %cst_23 = arith.constant dense<0.000000e+00> : vector<32xf32>
    %66 = vector.multi_reduction <add>, %65, %cst_23 [1] : vector<32x128xf32> to vector<32xf32>
    %67 = vector.shape_cast %66 : vector<32xf32> to vector<32x1xf32>
    %68 = tpu.reciprocal %67 : vector<32x1xf32> -> vector<32x1xf32>
    %69 = vector.broadcast %68 : vector<32x1xf32> to vector<32x128xf32>
    %70 = arith.mulf %65, %69 : vector<32x128xf32>
    %c64_i32 = arith.constant 64 : i32
    %71 = tpu.dynamic_rotate %70 by %c64_i32 dim 1 : vector<32x128xf32>, i32 -> vector<32x128xf32>
    %72 = arith.addf %39, %71 : vector<32x128xf32>
    %c0_24 = arith.constant 0 : index
    %c0_25 = arith.constant 0 : index
    %73 = vector.load %arg8[%c0_24, %c0_25] : memref<32x128xf32, #tpu.memory_space<vmem>>, vector<32x128xf32>
    tpu.vector_store %arg8[%c0_24, %c0_25], %72 {strides = array<i32>} : memref<32x128xf32, #tpu.memory_space<vmem>>, vector<32x128xf32>,
    return
  }
  func.func @transform_0(%arg0: i32) -> (i32, i32) {
    %c0_i32 = arith.constant 0 : i32
    %c0_i32_0 = arith.constant 0 : i32
    return %arg0, %c0_i32 : i32, i32
  }
  func.func @transform_1(%arg0: i32) -> (i32, i32) {
    %c0_i32 = arith.constant 0 : i32
    %c0_i32_0 = arith.constant 0 : i32
    %c0_i32_1 = arith.constant 0 : i32
    return %c0_i32, %c0_i32_0 : i32, i32
  }
  func.func @transform_2(%arg0: i32) -> (i32, i32) {
    %c0_i32 = arith.constant 0 : i32
    %c0_i32_0 = arith.constant 0 : i32
    %c0_i32_1 = arith.constant 0 : i32
    return %c0_i32, %c0_i32_0 : i32, i32
  }
  func.func @transform_3(%arg0: i32) -> (i32, i32) {
    %c0_i32 = arith.constant 0 : i32
    %c0_i32_0 = arith.constant 0 : i32
    %c0_i32_1 = arith.constant 0 : i32
    return %c0_i32, %c0_i32_0 : i32, i32
  }
  func.func @transform_4(%arg0: i32) -> (i32, i32) {
    %c0_i32 = arith.constant 0 : i32
    %c0_i32_0 = arith.constant 0 : i32
    %c0_i32_1 = arith.constant 0 : i32
    return %c0_i32, %c0_i32_0 : i32, i32
  }
  func.func @transform_5(%arg0: i32) -> (i32, i32) {
    %c0_i32 = arith.constant 0 : i32
    %c0_i32_0 = arith.constant 0 : i32
    %c0_i32_1 = arith.constant 0 : i32
    return %c0_i32, %c0_i32_0 : i32, i32
  }
  func.func @transform_6(%arg0: i32) -> (i32, i32) {
    %c0_i32 = arith.constant 0 : i32
    %c0_i32_0 = arith.constant 0 : i32
    %c0_i32_1 = arith.constant 0 : i32
    return %c0_i32, %c0_i32_0 : i32, i32
  }
  func.func @transform_7(%arg0: i32) -> (i32, i32) {
    %c0_i32 = arith.constant 0 : i32
    %c0_i32_0 = arith.constant 0 : i32
    return %arg0, %c0_i32 : i32, i32
  }
}

</mosaic_0001>

<bundles_post_ra>
// kernel: tpu_custom_call.1
= control target key start
LH: loop header
LB: loop body
LE: loop exit
PB: predicated region body
PF: predicated region fallthrough
CT: control target
= control target key end

     0   :  { %12 = vsyncpa [#allocation3], 0  ;;  %s1986_s0 = inlined_call_operand.vmem [shape: f32[64,4], index: 0, kind: input, shape index: {}]   ;;  %s1987_s1 = inlined_call_operand.vmem [shape: f32[2,128], index: 1, kind: input, shape index: {}]   ;;  %s1988_s2 = inlined_call_operand.vmem [shape: f32[1,128], index: 2, kind: input, shape index: {}]   ;;  %s1989_s3 = inlined_call_operand.hbm [shape: f32[128,128], index: 3, kind: input, shape index: {}]   ;;  %s1990_s4 = inlined_call_operand.vmem [shape: f32[1,128], index: 4, kind: input, shape index: {}]   ;;  %s1991_s5 = inlined_call_operand.hbm [shape: f32[128,128], index: 5, kind: input, shape index: {}]   ;;  %s1992_s6 = inlined_call_operand.vmem [shape: f32[1,128], index: 6, kind: input, shape index: {}]   ;;  %s1993_s7 = inlined_call_operand.hbm [shape: f32[64,128], index: 7, kind: output, shape index: {}]  }
   0x1   :  { %13 = vsyncpa [#allocation6], 0 }
   0x2   :  { %14 = vsyncpa [#allocation4], 0 }
   0x3   :  { %16 = vsyncpa [#allocation4 + $0x1], 0  ;;  %s1690_s24 = smov 0   ;;  %s1692_s25 = smov 0  }
   0x4   :  { %s1694_s26 = smov 0   ;;  %s1696_s27 = smov 0  }
   0x5 LB: > { %s1711_s28 = sadd.s32 4294967295, %s1636_s27   ;;  %s1018_s29 = sadd.s32 4294967294, %s1636_s27   ;;  %s1636_s27 = sphi %s1696_s27, %s2013_s27   ;;  %s1632_s26 = sphi %s1694_s26, %s2012_s26   ;;  %s1628_s25 = sphi %s1692_s25, %s2011_s25   ;;  %s1624_s24 = sphi %s1690_s24, %s2010_s24  }
   0x6   : > { %s1715_s30 = sadd.s32 1, %s1636_s27   ;;  %s181_s8 = sadd.s32 1, %s1632_s26 }
   0x7   : > { %s178_s9 = ssub.s32 %s1636_s27, %s1715_s30  ;;  %p191_p0 = scmp.ne.s32.totalorder %s1632_s26, %s1628_s25 }
   0x8   : > { %p179_p1 = scmp.eq.s32.totalorder %s178_s9, 0  ;;  %p192_p2 = scmp.eq.s32.totalorder %s1711_s28, 1 }
   0x9   : > { %p197_p3 = scmp.ne.s32.totalorder %s1628_s25, %s1624_s24  ;;  %p198_p4 = scmp.eq.s32.totalorder %s1018_s29, 1 }
   0xa   : > { %s1726_s10 = scalar_select %p179_p1, %s1632_s26, %s181_s8  }
   0xb   : > { %p1728_p5 = por %p192_p2, %p191_p0  ;;  %p1732_p6 = por %p198_p4, %p197_p3 }
   0xc   : > { %1997 = sst [smem:[#allocation11_spill]] %s1726_s10  ;;  %p1019_p7 = scmp.ge.s32.totalorder %s1636_s27, 1 }
   0xd   : > { %s1998_s11 = scalar_select %p1728_p5, 1, 0 }
   0xe   : > { %s1999_s12 = scalar_select %p1732_p6, 1, 0 }
   0xf   : > { %p205_p8 = scmp.lt.s32.totalorder %s1636_s27, 3  ;;  %p1994_p9 = scmp.eq.s32.totalorder %s1711_s28, 0 }
  0x10   : > { %s1638_s14 = smov [#allocation2]   ;;  %s1639_s17 = smov [#allocation5]  }
  0x11   : > { %p1739_p10 = pnand %p1019_p7, %p205_p8  ;;  %s223_s15 = sshll.u32 %s1638_s14, 4  ;;  %s224_s15 = int_to_ptr.vmem [resolvable:$true] %s223_s15 }
  0x12   : > { %s239_s18 = sshll.u32 %s1639_s17, 4  ;;  %s1510_s21 = scalar_lea.hbm %s1989_s3, 2048  ;;  %s1751_s18 = int_to_ptr.vmem [resolvable:$true] %s239_s18 }
  0x13   : > { %s2000_s13 = scalar_select %p1739_p10, 1, 0 }
  0x14   : > { %p1408_p11 = pneg %p1739_p10  ;;  %p1511_p13 = scmp.ne.s32.totalorder %s1989_s3, %s1510_s21 }
  0x15   : > { %p1517_p3 = scmp.lt.u32.totalorder %s1510_s21, %s1989_s3 }
  0x16   : > { %p1747_p12 = pnand %p1994_p9, %p1408_p11 }
  0x18   : > { %p1512_p0 = pneg %p1747_p12 }
  0x1a   : > { %p1513_p1 = pnand %p1512_p0, %p1511_p13 }
  0x1c   : > { %p1514_p2 = pneg %p1513_p1 }
  0x1e   : > { %p1519_p4 = pnand %p1517_p3, %p1514_p2 }
  0x20   : > { %1522 = shalt.err (!%p1519_p4)
}
  0x21   : > { %s1523_s9 = scalar_lea.vmem %s224_s15, 2048  ;;  %p1531_p9 = scmp.lt.s32.totalorder %s224_s15, %s224_s15 }
  0x22   : > { %p1524_p7 = scmp.ne.s32.totalorder %s224_s15, %s1523_s9  ;;  %p1532_p6 = scmp.lt.s32.totalorder %s1523_s9, %s1523_s9 }
  0x24   : > { %p1526_p8 = pnand %p1524_p7, %p1512_p0  ;;  %p1533_p5 = por %p1532_p6, %p1531_p9 }
  0x26   : > { %p1527_p11 = pneg %p1526_p8 }
  0x28   : > { %p1534_p10 = pnand %p1533_p5, %p1527_p11 }
  0x2a   : > { %1537 = shalt.err (!%p1534_p10)
}
  0x2b   : > { %s1640_s14 = smov 128   ;;  %s1641_s17 = smov 8  }
  0x2c   : > { %1411 = dma.hbm_to_vmem [thread:$0]  (!%p1747_p12), %s1989_s3, 2048, %s224_s15, [#allocation3], %s1640_s14, %s1640_s14, %s1641_s17  }
  0x2d   : > { %s1538_s23 = scalar_lea.hbm %s1991_s5, 2048 }
  0x2e   : > { %p1539_p13 = scmp.ne.s32.totalorder %s1991_s5, %s1538_s23  ;;  %p1545_p9 = scmp.lt.u32.totalorder %s1538_s23, %s1991_s5 }
  0x30   : > { %p1541_p5 = pnand %p1539_p13, %p1512_p0 }
  0x32   : > { %p1542_p6 = pneg %p1541_p5 }
  0x34   : > { %p1547_p10 = pnand %p1545_p9, %p1542_p6 }
  0x36   : > { %1550 = shalt.err (!%p1547_p10)
}
  0x37   : > { %s1551_s15 = scalar_lea.vmem %s1751_s18, 2048  ;;  %p1559_p4 = scmp.lt.s32.totalorder %s1751_s18, %s1751_s18 }
  0x38   : > { %p1552_p1 = scmp.ne.s32.totalorder %s1751_s18, %s1551_s15  ;;  %p1560_p7 = scmp.lt.s32.totalorder %s1551_s15, %s1551_s15 }
  0x3a   : > { %p1554_p2 = pnand %p1552_p1, %p1512_p0  ;;  %p1561_p8 = por %p1560_p7, %p1559_p4 }
  0x3c   : > { %p1555_p3 = pneg %p1554_p2 }
  0x3e   : > { %p1562_p11 = pnand %p1561_p8, %p1555_p3 }
  0x40   : > { %1565 = shalt.err (!%p1562_p11)
}
  0x41   : > { %1414 = dma.hbm_to_vmem [thread:$0]  (!%p1747_p12), %s1991_s5, 2048, %s1751_s18, [#allocation6], %s1640_s14, %s1640_s14, %s1641_s17  }
  0x42   : > { %p2002_p13 = scmp.ne.s32.totalorder %s2000_s13, 0 }
  0x43   : > { %p2003_p5 = scmp.eq.s32.totalorder (!%p2002_p13), %s1711_s28, 0 }
  0x44   : > { %267 = sbr.rel (%p2002_p13) target bundleno = 1146 (0x47a), region = 48 }
  0x4b   : > { %1611 = dma.done.wait (%p2003_p5), [#allocation3], 2048   ;;  %p2004_p0 = pmov %p2003_p5 }
  0x4d   : > { %1613 = vsyncadd (%p2004_p0), [#allocation3], 4294965248  ;;  %p2005_p6 = pmov %p2004_p0 }
  0x4e   : > { %p2006_p9 = pmov %p2004_p0 }
  0x4f   : > { %1615 = dma.done.wait (%p2005_p6), [#allocation6], 2048  }
  0x50   : > { %1617 = vsyncadd (%p2006_p9), [#allocation6], 4294965248  ;;  %s1027_s16 = sshll.u32 %s1711_s28, 2  ;;  %v1642_v0 = vmov 0   ;;  %v316_v3 = vld [vmem:[#allocation2] sm:$0xff]  ;;  %v317_v4 = vld [vmem:[#allocation2 + $0x8] sm:$0xff]  ;;  %v370_v53 = vlaneseq }
  0x51   : > { %1469 = vset.pattern.permute.xlu1 %v1642_v0  ;;  %1467 = vset.pattern.permute.xlu0 %v1642_v0  ;;  %p304_p12 = scmp.lt.s32.totalorder %s1027_s16, 7  ;;  %v1814_v5 = vpack.c.bf16 %v317_v4, %v316_v3  ;;  %v318_v6 = vld [vmem:[#allocation2 + $0x10] sm:$0xff]  ;;  %v319_v7 = vld [vmem:[#allocation2 + $0x18] sm:$0xff]  ;;  %v1643_v9 = vmov 2   ;;  %v320_v10 = vld [vmem:[#allocation2 + $0x20] sm:$0xff]  ;;  %v1644_v21 = vmov 3  }
  0x52   : > { %v1817_v8 = vpack.c.bf16 %v319_v7, %v318_v6  ;;  %v321_v11 = vld [vmem:[#allocation2 + $0x28] sm:$0xff]  ;;  %v322_v14 = vld [vmem:[#allocation2 + $0x30] sm:$0xff]  ;;  %v323_v15 = vld [vmem:[#allocation2 + $0x38] sm:$0xff]  ;;  %v1645_v22 = vmov 1   ;;  %v371_v54 = vshrl.u32 %v370_v53, 7  ;;  %s1646_s10 = smov 64  }
  0x53   : > { %s2015_s16 = smov (!%p304_p12, %s1027_s16), 7  ;;  %1271 = vmatprep.subr.bf16.mxu0 %v1814_v5  ;;  %v1821_v13 = vpack.c.bf16 %v321_v11, %v320_v10  ;;  %v1825_v17 = vpack.c.bf16 %v323_v15, %v322_v14  ;;  %v324_v18 = vld [vmem:[#allocation2 + $0x40] sm:$0xff]  ;;  %v325_v19 = vld [vmem:[#allocation2 + $0x48] sm:$0xff]  ;;  %v326_v23 = vld [vmem:[#allocation2 + $0x50] sm:$0xff]  ;;  %s300_s19 = sand.u32 1, %s1628_s25  }
  0x54   : > { %s1028_s13 = sshll.u32 %s2015_s16, 3  ;;  %1273 = vmatpush3.bf16.msra.mxu0 %v1814_v5  ;;  %v1829_v20 = vpack.c.bf16 %v325_v19, %v324_v18  ;;  %v327_v24 = vld [vmem:[#allocation2 + $0x58] sm:$0xff]  ;;  %v328_v26 = vld [vmem:[#allocation2 + $0x60] sm:$0xff]  ;;  %v329_v27 = vld [vmem:[#allocation2 + $0x68] sm:$0xff]  ;;  %v372_v55 = vsub.s32 0, %v371_v54  ;;  %v396_v56 = vsub.s32 1, %v371_v54 }
  0x55   : > { %s307_s17 = scalar_lea.vmem %s1986_s0, %s1028_s13  ;;  %1275 = vmatprep.subr.bf16.mxu0 %v1817_v8  ;;  %v1833_v25 = vpack.c.bf16 %v327_v24, %v326_v23  ;;  %v1837_v28 = vpack.c.bf16 %v329_v27, %v328_v26  ;;  %v330_v29 = vld [vmem:[#allocation2 + $0x70] sm:$0xff]  ;;  %v331_v30 = vld [vmem:[#allocation2 + $0x78] sm:$0xff]  ;;  %v333_v32 = vld [vmem:[#allocation5] sm:$0xff]  ;;  %s1026_s16 = sshll.u32 %s300_s19, 5 }
  0x56   : > { %v311_v1 = vld [vmem:[%s307_s17 + $0x8] sm:$0xff]  ;;  %v310_v2 = vld [vmem:[%s307_s17] sm:$0xff]  ;;  %v312_v12 = vld [vmem:[%s307_s17 + $0x10] sm:$0xff]  ;;  %v1841_v31 = vpack.c.bf16 %v331_v30, %v330_v29  ;;  %s302_s13 = scalar_lea.vmem [#allocation7], %s1026_s16  ;;  %s1037_s14 = sshll.u32 %s1711_s28, 9 }
  0x57   : > { %357 = vperm.xlu1 %1469, %v311_v1   ;;  %352 = vperm.xlu0 %1467, %v310_v2   ;;  %v313_v16 = vld [vmem:[%s307_s17 + $0x18] sm:$0xff]  ;;  %v334_v33 = vld [vmem:[#allocation5 + $0x8] sm:$0xff]  ;;  %v335_v34 = vld [vmem:[#allocation5 + $0x10] sm:$0xff]  ;;  %s934_s18 = sshll.u32 %s302_s13, 4  ;;  %s1943_s21 = scalar_lea.hbm %s1993_s7, %s1037_s14  ;;  %s1938_s18 = int_to_ptr.vmem [resolvable:$true] %s934_s18 }
  0x58   : > { %1277 = vmatpush3.bf16.msra.mxu0 %v1817_v8  ;;  %v1847_v35 = vpack.c.bf16 %v334_v33, %v333_v32  ;;  %v336_v36 = vld [vmem:[#allocation5 + $0x18] sm:$0xff]  ;;  %v337_v38 = vld [vmem:[#allocation5 + $0x20] sm:$0xff]  ;;  %v338_v39 = vld [vmem:[#allocation5 + $0x28] sm:$0xff]  ;;  %s1945_s22 = scalar_lea.sflag [#allocation4], %s300_s19  ;;  %s1566_s23 = scalar_lea.vmem %s1938_s18, 512 }
  0x59   : > { %1279 = vmatprep.subr.bf16.mxu0 %v1821_v13  ;;  %v1849_v37 = vpack.c.bf16 %v336_v36, %v335_v34  ;;  %v1854_v40 = vpack.c.bf16 %v338_v39, %v337_v38  ;;  %v339_v41 = vld [vmem:[#allocation5 + $0x30] sm:$0xff]  ;;  %v340_v42 = vld [vmem:[#allocation5 + $0x38] sm:$0xff]  ;;  %v341_v44 = vld [vmem:[#allocation5 + $0x40] sm:$0xff]  ;;  %p1567_p10 = scmp.ne.s32.totalorder %s1938_s18, %s1566_s23  ;;  %p2007_p1 = scmp.ne.s32.totalorder %s1998_s11, 0 }
  0x5a   : > { %1303 = vmatprep.subr.bf16.mxu1 %v1847_v35  ;;  %v1858_v43 = vpack.c.bf16 %v340_v42, %v339_v41  ;;  %v342_v45 = vld [vmem:[#allocation5 + $0x48] sm:$0xff]  ;;  %v343_v47 = vld [vmem:[#allocation5 + $0x50] sm:$0xff]  ;;  %v344_v48 = vld [vmem:[#allocation5 + $0x58] sm:$0xff]  ;;  %s1647_s28 = smov [#allocation7]  }
  0x5b   : > { %1470 = vset.pattern.permute.xlu1 %v1643_v9  ;;  %1468 = vset.pattern.permute.xlu0 %v1643_v9  ;;  %v1862_v46 = vpack.c.bf16 %v342_v45, %v341_v44  ;;  %v1866_v49 = vpack.c.bf16 %v344_v48, %v343_v47  ;;  %v345_v50 = vld [vmem:[#allocation5 + $0x60] sm:$0xff]  ;;  %v346_v51 = vld [vmem:[#allocation5 + $0x68] sm:$0xff]  ;;  %p1568_p2 = pnand %p1567_p10, %p2007_p1  ;;  %s1570_s29 = sshll.u32 %s1647_s28, 4  ;;  %s1571_s29 = int_to_ptr.vmem [resolvable:$false] %s1570_s29 }
  0x5c   : > { %383 = vperm.xlu1 %1470, %v311_v1   ;;  %379 = vperm.xlu0 %1468, %v310_v2   ;;  %v1870_v52 = vpack.c.bf16 %v346_v51, %v345_v50  ;;  %v314_v57 = vld [vmem:[%s1987_s1] sm:$0x3]  ;;  %s1572_s8 = scalar_lea.vmem %s1571_s29, 1024  ;;  %p1573_p4 = scmp.lt.s32.totalorder %s1938_s18, %s1571_s29 }
  0x5d   : > { %1281 = vmatpush3.bf16.msra.mxu0 %v1821_v13  ;;  %1305 = vmatpush3.bf16.msra.mxu1 %v1847_v35  ;;  %v1878_v60 = vrot.slane %v314_v57, %v372_v55  ;;  %v397_v61 = vrot.slane %v314_v57, %v396_v56  ;;  %v1885_v4 = vld [vmem:[%s1988_s2] ss:$0 sm:$0xff]  ;;  %p1569_p3 = pneg %p1568_p2  ;;  %p1574_p7 = scmp.lt.s32.totalorder %s1572_s8, %s1566_s23 }
  0x5e   : > { %1283 = vmatprep.subr.bf16.mxu0 %v1825_v17  ;;  %1307 = vmatprep.subr.bf16.mxu1 %v1849_v37 }
  0x5f   : > { %p1575_p8 = por %p1574_p7, %p1573_p4 }
  0x60   : > { %1471 = vset.pattern.permute.xlu1 %v1642_v0  ;;  %387 = vperm.xlu0 %1468, %v312_v12  }
  0x61   : > { %362 = vperm.xlu1 %1471, %v312_v12   ;;  %1285 = vmatpush3.bf16.msra.mxu0 %v1825_v17  ;;  %p1576_p11 = pnand %p1575_p8, %p1569_p3 }
  0x62   : > { %1287 = vmatprep.subr.bf16.mxu0 %v1829_v20  ;;  %1309 = vmatpush3.bf16.msra.mxu1 %v1849_v37 }
  0x63   : > { %1311 = vmatprep.subr.bf16.mxu1 %v1854_v40 }
  0x64   : > { %391 = vperm.xlu0 %1468, %v313_v16  }
  0x65   : > { %367 = vperm.xlu1 %1471, %v313_v16   ;;  %1289 = vmatpush3.bf16.msra.mxu0 %v1829_v20 }
  0x66   : > { %1291 = vmatprep.subr.bf16.mxu0 %v1833_v25  ;;  %1313 = vmatpush3.bf16.msra.mxu1 %v1854_v40 }
  0x67   : > { %1315 = vmatprep.subr.bf16.mxu1 %v1858_v43 }
  0x68   : > { %1473 = vset.pattern.permute.xlu0 %v1644_v21 }
  0x69   : > { %1472 = vset.pattern.permute.xlu1 %v1645_v22  ;;  %663 = vperm.xlu0 %1473, %v310_v2  }
  0x6a   : > { %643 = vperm.xlu1 %1472, %v310_v2   ;;  %1293 = vmatpush3.bf16.msra.mxu0 %v1833_v25 }
  0x6b   : > { %1295 = vmatprep.subr.bf16.mxu0 %v1837_v28  ;;  %1317 = vmatpush3.bf16.msra.mxu1 %v1858_v43 }
  0x6c   : > { %1319 = vmatprep.subr.bf16.mxu1 %v1862_v46 }
  0x6d   : > { %1475 = vset.pattern.permute.xlu0 %v1645_v22 }
  0x6e   : > { %647 = vperm.xlu1 %1472, %v311_v1   ;;  %651 = vperm.xlu0 %1475, %v312_v12  }
  0x6f   : > { %1297 = vmatpush3.bf16.msra.mxu0 %v1837_v28  ;;  %1321 = vmatpush3.bf16.msra.mxu1 %v1862_v46 }
  0x70   : > { %1299 = vmatprep.subr.bf16.mxu0 %v1841_v31  ;;  %1323 = vmatprep.subr.bf16.mxu1 %v1866_v49 }
  0x72   : > { %1474 = vset.pattern.permute.xlu1 %v1644_v21  ;;  %1477 = vset.pattern.permute.xlu0 %v1644_v21 }
  0x73   : > { %667 = vperm.xlu1 %1474, %v311_v1   ;;  %675 = vperm.xlu0 %1477, %v313_v16  }
  0x74   : > { %1301 = vmatpush3.bf16.msra.mxu0 %v1841_v31  ;;  %1325 = vmatpush3.bf16.msra.mxu1 %v1866_v49 }
  0x75   : > { %1335 = vmatprep.subr.bf16.mxu0 %v1814_v5  ;;  %1327 = vmatprep.subr.bf16.mxu1 %v1870_v52 }
  0x77   : > { %671 = vperm.xlu1 %1474, %v312_v12  }
  0x78   : > { %1329 = vmatpush3.bf16.msra.mxu1 %v1870_v52 }
  0x7b   : > { %1476 = vset.pattern.permute.xlu1 %v1645_v22 }
  0x7c   : > { %655 = vperm.xlu1 %1476, %v313_v16  }
  0xd6   : > { %v353_v58 = vpop.permute.xlu0 %352  ;;  %v358_v59 = vpop.permute.xlu1 %357 }
  0xd7   : > { %v374_v0 = vmul.f32 %v1878_v60, %v353_v58  ;;  %v375_v1 = vmul.f32 %v1878_v60, %v358_v59 }
  0xdb   : > { %v384_v62 = vpop.permute.xlu1 %383  ;;  %v380_v63 = vpop.permute.xlu0 %379 }
  0xdc   : > { %v399_v2 = vmul.f32 %v397_v61, %v384_v62  ;;  %v398_v3 = vmul.f32 %v397_v61, %v380_v63  ;;  %v348_v63 = vld [vmem:[#allocation5 + $0x78] sm:$0xff] }
  0xde   : > { %v403_v6 = vadd.f32 %v399_v2, %v375_v1  ;;  %v402_v7 = vadd.f32 %v398_v3, %v374_v0  ;;  %v1030_v0 = vld [vmem:[%s1990_s4] ss:$0 sm:$0xff] }
  0xdf   : > { %v388_v9 = vpop.permute.xlu0 %387 }
  0xe0   : > { %v400_v10 = vmul.f32 %v397_v61, %v388_v9  ;;  %v363_v11 = vpop.permute.xlu1 %362  ;;  %v412_v12 = vadd.f32 %v1885_v4, %v402_v7  ;;  %v413_v14 = vadd.f32 %v1885_v4, %v403_v6 }
  0xe1   : > { %v376_v15 = vmul.f32 %v1878_v60, %v363_v11 }
  0xe2   : > { %v416_v16 = vmax.f32 %v412_v12, 0.0  ;;  %v417_v18 = vmax.f32 %v413_v14, 0.0 }
  0xe3   : > { %v404_v19 = vadd.f32 %v400_v10, %v376_v15  ;;  %v392_v21 = vpop.permute.xlu0 %391 }
  0xe4   : > { %v401_v22 = vmul.f32 %v397_v61, %v392_v21  ;;  %v368_v23 = vpop.permute.xlu1 %367  ;;  %1150 = vmatprep.mubr.f32.mxu0 %v416_v16 }
  0xe5   : > { %v377_v24 = vmul.f32 %v1878_v60, %v368_v23  ;;  %1151 = vmatmul.mubr.f32.vlgmr.msra.gmra.mrb[0].mxu0 %v417_v18  ;;  %v414_v26 = vadd.f32 %v1885_v4, %v404_v19 }
  0xe6   : > { %1337 = vmatpush3.bf16.msra.mxu0 %v1814_v5 }
  0xe7   : > { %v405_v27 = vadd.f32 %v401_v22, %v377_v24  ;;  %1339 = vmatprep.subr.bf16.mxu0 %v1817_v8  ;;  %v418_v29 = vmax.f32 %v414_v26, 0.0 }
  0xe8   : > { %v664_v30 = vpop.permute.xlu0 %663 }
  0xe9   : > { %v644_v32 = vpop.permute.xlu1 %643  ;;  %1153 = vmatprep.mubr.f32.mxu0 %v418_v29  ;;  %v415_v33 = vadd.f32 %v1885_v4, %v405_v27  ;;  %v678_v34 = vmul.f32 %v664_v30, %v397_v61  ;;  %v1031_v27 = vld [vmem:[%s1992_s6] ss:$0 sm:$0xff] }
  0xea   : > { %v658_v36 = vmul.f32 %v644_v32, %v1878_v60  ;;  %1341 = vmatpush3.bf16.msra.mxu0 %v1817_v8 }
  0xeb   : > { %1343 = vmatprep.subr.bf16.mxu0 %v1821_v13  ;;  %v419_v38 = vmax.f32 %v415_v33, 0.0 }
  0xec   : > { %v682_v39 = vadd.f32 %v678_v34, %v658_v36 }
  0xed   : > { %v648_v41 = vpop.permute.xlu1 %647  ;;  %1154 = vmatmul.mubr.f32.gmra.mrb[2].mxu0 %v419_v38  ;;  %v652_v8 = vpop.permute.xlu0 %651 }
  0xee   : > { %1345 = vmatpush3.bf16.msra.mxu0 %v1821_v13  ;;  %v686_v5 = vadd.f32 %v1885_v4, %v682_v39  ;;  %v660_v50 = vmul.f32 %v652_v8, %v1878_v60  ;;  %v659_v51 = vmul.f32 %v648_v41, %v1878_v60 }
  0xef   : > { %1347 = vmatprep.subr.bf16.mxu0 %v1825_v17 }
  0xf0   : > { %v690_v42 = vmax.f32 %v686_v5, 0.0 }
  0xf2   : > { %1349 = vmatpush3.bf16.msra.mxu0 %v1825_v17  ;;  %v668_v44 = vpop.permute.xlu1 %667  ;;  %1226 = vmatprep.mubr.f32.mxu0 %v690_v42  ;;  %v676_v48 = vpop.permute.xlu0 %675 }
  0xf3   : > { %1351 = vmatprep.subr.bf16.mxu0 %v1829_v20  ;;  %v679_v47 = vmul.f32 %v668_v44, %v397_v61  ;;  %v681_v17 = vmul.f32 %v676_v48, %v397_v61 }
  0xf5   : > { %v683_v53 = vadd.f32 %v679_v47, %v659_v51 }
  0xf6   : > { %1353 = vmatpush3.bf16.msra.mxu0 %v1829_v20  ;;  %v672_v45 = vpop.permute.xlu1 %671 }
  0xf7   : > { %1355 = vmatprep.subr.bf16.mxu0 %v1833_v25  ;;  %v680_v13 = vmul.f32 %v672_v45, %v397_v61  ;;  %v687_v57 = vadd.f32 %v1885_v4, %v683_v53 }
  0xf9   : > { %v684_v55 = vadd.f32 %v680_v13, %v660_v50 }
  0xfa   : > { %1357 = vmatpush3.bf16.msra.mxu0 %v1833_v25  ;;  %v691_v25 = vmax.f32 %v687_v57, 0.0 }
  0xfb   : > { %1359 = vmatprep.subr.bf16.mxu0 %v1837_v28  ;;  %v656_v54 = vpop.permute.xlu1 %655  ;;  %v688_v58 = vadd.f32 %v1885_v4, %v684_v55 }
  0xfc   : > { %v661_v20 = vmul.f32 %v656_v54, %v1878_v60  ;;  %v347_v60 = vld [vmem:[#allocation5 + $0x70] sm:$0xff] }
  0xfd   : > { %v692_v61 = vmax.f32 %v688_v58, 0.0 }
  0xfe   : > { %1361 = vmatpush3.bf16.msra.mxu0 %v1837_v28  ;;  %v685_v56 = vadd.f32 %v681_v17, %v661_v20  ;;  %v1330_v28 = vpack.c.bf16 %v348_v63, %v347_v60 }
  0xff   : > { %1363 = vmatprep.subr.bf16.mxu0 %v1841_v31 }
 0x100   : > { %v689_v59 = vadd.f32 %v1885_v4, %v685_v56  ;;  %1331 = vmatprep.subr.bf16.mxu1 %v1330_v28 }
 0x101   : > { %1333 = vmatpush3.bf16.msra.mxu1 %v1330_v28 }
 0x102   : > { %1365 = vmatpush3.bf16.msra.mxu0 %v1841_v31  ;;  %v693_v62 = vmax.f32 %v689_v59, 0.0  ;;  %1367 = vmatprep.subr.bf16.mxu1 %v1847_v35 }
 0x105   : > { %1227 = vmatmul.mubr.f32.vlgmr.msra.gmra.mrb[4].mxu0 %v691_v25 }
 0x106   : > { %1229 = vmatprep.mubr.f32.mxu0 %v692_v61 }
 0x109   : > { %1230 = vmatmul.mubr.f32.gmra.mrb[6].mxu0 %v693_v62 }
 0x1b8   : > { %v1152_v1 = vpop.f32.mrb[0].mxu0 }
 0x1b9   : > { %v498_v2 = vadd.f32 %v1152_v1, %v1030_v0  ;;  %v492_v31 = vpop.f32.mrb[1].mxu0 }
 0x1ba   : > { %v493_v3 = vadd.f32 %v1030_v0, %v492_v31 }
 0x1bb   : > { %v512_v6 = vmax.f32 %v498_v2, 0.0 }
 0x1bc   : > { %v511_v4 = vmax.f32 %v493_v3, 0.0 }
 0x1be   : > { %1188 = vmatprep.mubr.f32.mxu1 %v511_v4 }
 0x1bf   : > { %1189 = vmatmul.mubr.f32.vlgmr.msra.gmra.mrb[0].mxu1 %v512_v6 }
 0x1c0   : > { %1369 = vmatpush3.bf16.msra.mxu1 %v1847_v35  ;;  %v1155_v7 = vpop.f32.mrb[2].mxu0 }
 0x1c1   : > { %v508_v9 = vadd.f32 %v1155_v7, %v1030_v0  ;;  %v502_v10 = vpop.f32.mrb[3].mxu0  ;;  %1371 = vmatprep.subr.bf16.mxu1 %v1849_v37 }
 0x1c2   : > { %v503_v11 = vadd.f32 %v1030_v0, %v502_v10 }
 0x1c3   : > { %v514_v14 = vmax.f32 %v508_v9, 0.0 }
 0x1c4   : > { %v513_v12 = vmax.f32 %v503_v11, 0.0  ;;  %1373 = vmatpush3.bf16.msra.mxu1 %v1849_v37 }
 0x1c5   : > { %1375 = vmatprep.subr.bf16.mxu1 %v1854_v40 }
 0x1c6   : > { %1191 = vmatprep.mubr.f32.mxu1 %v513_v12 }
 0x1c7   : > { %1192 = vmatmul.mubr.f32.gmra.mrb[2].mxu1 %v514_v14 }
 0x1c8   : > { %1377 = vmatpush3.bf16.msra.mxu1 %v1854_v40 }
 0x1c9   : > { %1379 = vmatprep.subr.bf16.mxu1 %v1858_v43 }
 0x1cc   : > { %1381 = vmatpush3.bf16.msra.mxu1 %v1858_v43 }
 0x1cd   : > { %1383 = vmatprep.subr.bf16.mxu1 %v1862_v46 }
 0x1d0   : > { %1385 = vmatpush3.bf16.msra.mxu1 %v1862_v46 }
 0x1d1   : > { %1387 = vmatprep.subr.bf16.mxu1 %v1866_v49 }
 0x1d4   : > { %1389 = vmatpush3.bf16.msra.mxu1 %v1866_v49 }
 0x1d5   : > { %1391 = vmatprep.subr.bf16.mxu1 %v1870_v52 }
 0x1d8   : > { %v1228_v35 = vpop.f32.mrb[4].mxu0  ;;  %1393 = vmatpush3.bf16.msra.mxu1 %v1870_v52 }
 0x1d9   : > { %v766_v37 = vadd.f32 %v1228_v35, %v1030_v0  ;;  %v760_v15 = vpop.f32.mrb[5].mxu0  ;;  %1395 = vmatprep.subr.bf16.mxu1 %v1330_v28 }
 0x1da   : > { %v761_v40 = vadd.f32 %v1030_v0, %v760_v15 }
 0x1db   : > { %v780_v43 = vmax.f32 %v766_v37, 0.0 }
 0x1dc   : > { %v779_v16 = vmax.f32 %v761_v40, 0.0  ;;  %v1231_v18 = vpop.f32.mrb[6].mxu0  ;;  %1397 = vmatpush3.bf16.msra.mxu1 %v1330_v28 }
 0x1dd   : > { %v776_v19 = vadd.f32 %v1231_v18, %v1030_v0  ;;  %v770_v21 = vpop.f32.mrb[7].mxu0 }
 0x1de   : > { %v771_v46 = vadd.f32 %v1030_v0, %v770_v21  ;;  %1264 = vmatprep.mubr.f32.mxu1 %v779_v16 }
 0x1df   : > { %1265 = vmatmul.mubr.f32.vlgmr.msra.gmra.mrb[4].mxu1 %v780_v43  ;;  %v782_v49 = vmax.f32 %v776_v19, 0.0 }
 0x1e0   : > { %v781_v22 = vmax.f32 %v771_v46, 0.0 }
 0x1e2   : > { %1267 = vmatprep.mubr.f32.mxu1 %v781_v22 }
 0x1e3   : > { %1268 = vmatmul.mubr.f32.gmra.mrb[6].mxu1 %v782_v49 }
 0x292   : > { %v1190_v23 = vpop.f32.mrb[0].mxu1 }
 0x293   : > { %v587_v24 = vpop.f32.mrb[1].mxu1  ;;  %v593_v41 = vadd.f32 %v1190_v23, %v1031_v27 }
 0x294   : > { %v588_v5 = vadd.f32 %v1031_v27, %v587_v24 }
 0x29a   : > { %v1193_v52 = vpop.f32.mrb[2].mxu1 }
 0x29b   : > { %v597_v26 = vpop.f32.mrb[3].mxu1  ;;  %v603_v42 = vadd.f32 %v1193_v52, %v1031_v27 }
 0x29c   : > { %v598_v44 = vadd.f32 %v1031_v27, %v597_v26 }
 0x2b2   : > { %v1266_v29 = vpop.f32.mrb[4].mxu1 }
 0x2b3   : > { %v855_v30 = vadd.f32 %v1266_v29, %v1031_v27  ;;  %v849_v32 = vpop.f32.mrb[5].mxu1 }
 0x2b4   : > { %v850_v33 = vadd.f32 %v1031_v27, %v849_v32 }
 0x2b5   : > { %870 = vmax.xlane.f32.xlu0 %v855_v30 }
 0x2b6   : > { %868 = vmax.xlane.f32.xlu1 %v850_v33  ;;  %v1269_v34 = vpop.f32.mrb[6].mxu1 }
 0x2b7   : > { %v865_v36 = vadd.f32 %v1269_v34, %v1031_v27  ;;  %v859_v38 = vpop.f32.mrb[7].mxu1 }
 0x2b8   : > { %v860_v39 = vadd.f32 %v1031_v27, %v859_v38 }
 0x2b9   : > { %874 = vmax.xlane.f32.xlu0 %v865_v36 }
 0x2ba   : > { %872 = vmax.xlane.f32.xlu1 %v860_v39 }
 0x2bd   : > { %608 = vmax.xlane.f32.xlu0 %v593_v41 }
 0x2be   : > { %606 = vmax.xlane.f32.xlu1 %v588_v5 }
 0x2c1   : > { %612 = vmax.xlane.f32.xlu0 %v603_v42 }
 0x2c2   : > { %610 = vmax.xlane.f32.xlu1 %v598_v44 }
 0x342   : > { %v871_v8 = vpop.xlane.xlu0 %870 }
 0x343   : > { %v877_v45 = vsub.f32 %v855_v30, %v871_v8  ;;  %v869_v47 = vpop.xlane.xlu1 %868 }
 0x344   : > { %v876_v48 = vsub.f32 %v850_v33, %v869_v47 }
 0x345   : > { %v882_v13 = vmul.f32 1.442695, %v877_v45 }
 0x346   : > { %v880_v50 = vmul.f32 1.442695, %v876_v48  ;;  %v875_v51 = vpop.xlane.xlu0 %874 }
 0x347   : > { %1478 = vpow2.f32 %v882_v13  ;;  %v879_v17 = vsub.f32 %v865_v36, %v875_v51  ;;  %v873_v53 = vpop.xlane.xlu1 %872 }
 0x348   : > { %1480 = vpow2.f32 %v880_v50  ;;  %v878_v54 = vsub.f32 %v860_v39, %v873_v53 }
 0x349   : > { %v886_v55 = vmul.f32 1.442695, %v879_v17 }
 0x34a   : > { %v884_v20 = vmul.f32 1.442695, %v878_v54  ;;  %v609_v56 = vpop.xlane.xlu0 %608 }
 0x34b   : > { %1482 = vpow2.f32 %v886_v55  ;;  %v615_v57 = vsub.f32 %v593_v41, %v609_v56  ;;  %v607_v58 = vpop.xlane.xlu1 %606 }
 0x34c   : > { %1484 = vpow2.f32 %v884_v20  ;;  %v614_v59 = vsub.f32 %v588_v5, %v607_v58 }
 0x34d   : > { %v620_v25 = vmul.f32 1.442695, %v615_v57 }
 0x34e   : > { %v618_v61 = vmul.f32 1.442695, %v614_v59  ;;  %v613_v62 = vpop.xlane.xlu0 %612 }
 0x34f   : > { %1486 = vpow2.f32 %v620_v25  ;;  %v617_v60 = vsub.f32 %v603_v42, %v613_v62  ;;  %v611_v63 = vpop.xlane.xlu1 %610 }
 0x350   : > { %1488 = vpow2.f32 %v618_v61  ;;  %v616_v28 = vsub.f32 %v598_v44, %v611_v63 }
 0x351   : > { %v1479_v0 = vpop.eup %1478  ;;  %v624_v1 = vmul.f32 1.442695, %v617_v60 }
 0x352   : > { %v1481_v2 = vpop.eup %1480  ;;  %v622_v31 = vmul.f32 1.442695, %v616_v28  ;;  %890 = vadd.xlane.f32.xlu0 %v1479_v0 }
 0x353   : > { %1490 = vpow2.f32 %v624_v1  ;;  %888 = vadd.xlane.f32.xlu1 %v1481_v2 }
 0x354   : > { %1492 = vpow2.f32 %v622_v31 }
 0x355   : > { %v1483_v3 = vpop.eup %1482 }
 0x356   : > { %v1485_v4 = vpop.eup %1484  ;;  %894 = vadd.xlane.f32.xlu0 %v1483_v3 }
 0x357   : > { %892 = vadd.xlane.f32.xlu1 %v1485_v4 }
 0x359   : > { %v1487_v6 = vpop.eup %1486 }
 0x35a   : > { %v1489_v7 = vpop.eup %1488  ;;  %628 = vadd.xlane.f32.xlu0 %v1487_v6 }
 0x35b   : > { %626 = vadd.xlane.f32.xlu1 %v1489_v7 }
 0x35d   : > { %v1491_v9 = vpop.eup %1490 }
 0x35e   : > { %v1493_v10 = vpop.eup %1492  ;;  %632 = vadd.xlane.f32.xlu0 %v1491_v9 }
 0x35f   : > { %630 = vadd.xlane.f32.xlu1 %v1493_v10 }
 0x3df   : > { %v891_v11 = vpop.xlane.xlu0 %890 }
 0x3e0   : > { %1494 = vrcp.f32 %v891_v11  ;;  %v889_v12 = vpop.xlane.xlu1 %888 }
 0x3e1   : > { %1496 = vrcp.f32 %v889_v12 }
 0x3e3   : > { %v895_v14 = vpop.xlane.xlu0 %894 }
 0x3e4   : > { %v893_v35 = vpop.xlane.xlu1 %892 }
 0x3e5   : > { %1498 = vrcp.f32 %v893_v35 }
 0x3e6   : > { %1500 = vrcp.f32 %v895_v14 }
 0x3e7   : > { %v629_v22 = vpop.xlane.xlu0 %628 }
 0x3e8   : > { %v627_v46 = vpop.xlane.xlu1 %626  ;;  %1502 = vrcp.f32 %v629_v22 }
 0x3e9   : > { %1504 = vrcp.f32 %v627_v46 }
 0x3ea   : > { %v1495_v37 = vpop.eup %1494 }
 0x3eb   : > { %v1497_v15 = vpop.eup %1496  ;;  %v901_v40 = vmul.f32 %v1495_v37, %v1479_v0  ;;  %v633_v23 = vpop.xlane.xlu0 %632 }
 0x3ec   : > { %v900_v16 = vmul.f32 %v1497_v15, %v1481_v2  ;;  %v631_v49 = vpop.xlane.xlu1 %630 }
 0x3ed   : > { %906 = vrot.lane.b32.xlu0 %v901_v40, %s1646_s10  ;;  %1506 = vrcp.f32 %v631_v49 }
 0x3ee   : > { %904 = vrot.lane.b32.xlu1 %v900_v16, %s1646_s10  ;;  %1508 = vrcp.f32 %v633_v23 }
 0x3ef   : > { %v1499_v18 = vpop.eup %1498 }
 0x3f0   : > { %v902_v43 = vmul.f32 %v1499_v18, %v1485_v4  ;;  %v1501_v19 = vpop.eup %1500 }
 0x3f1   : > { %v903_v21 = vmul.f32 %v1501_v19, %v1483_v3 }
 0x3f2   : > { %908 = vrot.lane.b32.xlu1 %v902_v43, %s1646_s10  ;;  %v1503_v24 = vpop.eup %1502 }
 0x3f3   : > { %v1505_v52 = vpop.eup %1504  ;;  %v639_v26 = vmul.f32 %v1503_v24, %v1487_v6 }
 0x3f4   : > { %v638_v29 = vmul.f32 %v1505_v52, %v1489_v7 }
 0x3f6   : > { %910 = vrot.lane.b32.xlu1 %v903_v21, %s1646_s10 }
 0x3f7   : > { %v1507_v30 = vpop.eup %1506 }
 0x3f8   : > { %v640_v36 = vmul.f32 %v1507_v30, %v1493_v10  ;;  %v1509_v38 = vpop.eup %1508 }
 0x3f9   : > { %v641_v5 = vmul.f32 %v1509_v38, %v1491_v9 }
 0x45f   : > { %v907_v27 = vpop.permute.xlu0 %906 }
 0x460   : > { %v913_v32 = vadd.f32 %v907_v27, %v639_v26  ;;  %v905_v33 = vpop.permute.xlu1 %904 }
 0x461   : > { %v912_v34 = vadd.f32 %v905_v33, %v638_v29 }
 0x462   : > { %917 = vst [vmem:[%s302_s13 + $0x8] sm:$0xff] %v913_v32 }
 0x463   : > { %916 = vst [vmem:[%s302_s13] sm:$0xff] %v912_v34 }
 0x464   : > { %v909_v39 = vpop.permute.xlu1 %908 }
 0x465   : > { %v914_v41 = vadd.f32 %v909_v39, %v640_v36 }
 0x467   : > { %918 = vst [vmem:[%s302_s13 + $0x10] sm:$0xff] %v914_v41 }
 0x468   : > { %v911_v42 = vpop.permute.xlu1 %910 }
 0x469   : > { %v915_v44 = vadd.f32 %v911_v42, %v641_v5 }
 0x46b   : > { %919 = vst [vmem:[%s302_s13 + $0x18] sm:$0xff] %v915_v44 }
 0x46c   : > { %1579 = shalt.err (!%p1576_p11)
}
 0x46d   : > { %s1580_s9 = scalar_lea.hbm %s1943_s21, 512  ;;  %s1584_s19 = scalar_lea.hbm %s1993_s7, 1024 }
 0x46e   : > { %p1581_p13 = scmp.ne.s32.totalorder %s1943_s21, %s1580_s9  ;;  %p1585_p6 = scmp.lt.u32.totalorder %s1943_s21, %s1993_s7 }
 0x46f   : > { %p1586_p9 = scmp.lt.u32.totalorder %s1584_s19, %s1580_s9  ;;  %p1588_p10 = scmp.lt.u32.totalorder %s1580_s9, %s1943_s21 }
 0x470   : > { %p1582_p5 = pnand %p1581_p13, %p2007_p1 }
 0x471   : > { %p1587_p12 = por %p1586_p9, %p1585_p6 }
 0x472   : > { %p1583_p0 = pneg %p1582_p5 }
 0x473   : > { %p1589_p2 = por %p1588_p10, %p1587_p12 }
 0x475   : > { %p1590_p3 = pnand %p1589_p2, %p1583_p0 }
 0x477   : > { %1593 = shalt.err (!%p1590_p3)
}
 0x478   : > { %s1648_s14 = smov 128   ;;  %s1649_s17 = smov 8  }
 0x479   : > { %1406 = dma.vmem_to_hbm [thread:$0]  (%p2007_p1), %s1938_s18, 512, %s1943_s21, %s1945_s22, %s1648_s14, %s1648_s14, %s1649_s17  }
 0x47a PF: > { %p1423_p4 = scmp.ge.s32.totalorder %s1636_s27, 2  ;;  %s949_s20 = sand.u32 1, %s1624_s24  }
 0x47b   : > { %p2008_p7 = scmp.ne.s32.totalorder %s1999_s12, 0  ;;  %s950_s23 = scalar_lea.sflag [#allocation4], %s949_s20 }
 0x47d   : > { %p1416_p8 = pnand %p1423_p4, %p2008_p7 }
 0x47f   : > { %1619 = dma.done.wait (!%p1416_p8), %s950_s23, 512  }
 0x480   : > { %1621 = vsyncadd (!%p1416_p8), %s950_s23, 4294966784  ;;  %s2009_s28 = sld [smem:[#allocation11_spill]]  ;;  %p19_p11 = scmp.ge.s32.totalorder %s1715_s30, 4  }
 0x481   : > { %s2010_s24 = smov %s1628_s25  ;;  %s2011_s25 = smov %s1632_s26 }
 0x482   : > { %s2013_s27 = smov %s1715_s30  ;;  %21 = sbr.rel (!%p19_p11) target bundleno = 5 (0x5), region = 92 }
 0x486   : > { %s2012_s26 = smov %s2009_s28 }
 0x489   :  { %955 = vsyncpa [#allocation3], 1 }
 0x48a   :  { %957 = vsyncpa [#allocation3 + $0x1], 1 }
 0x48b   :  { %958 = vsyncpa [#allocation6], 1 }
 0x48c   :  { %959 = vsyncpa [#allocation4], 1 }
 0x48d   :  { %961 = vsyncpa [#allocation4 + $0x1], 1 }

</bundles_post_ra>
